<compile_context>
chip_gen: v7x
topology: tpu7x:2x2x1
jax: 0.10.0
libtpu: 0.0.40
codegen_flags: <defaults>
</compile_context>

<pallas_src>
import jax
import jax.numpy as jnp
from jax.experimental import pallas as pl
from jax.experimental.pallas import tpu as pltpu


def _round_up(n: int, m: int) -> int:
    return ((n + m - 1) // m) * m


def _tpu_vmem_capacity_bytes() -> int:
    """Physical VMEM per TensorCore; conservative fallback when unknown."""
    try:
        return int(pltpu.get_tpu_info().vmem_capacity_bytes)
    except Exception:
        pass
    try:
        kind = jax.devices()[0].device_kind.lower()
    except Exception:
        kind = ""
    if ("v5" in kind) or ("v6" in kind):
        return 128 * 1024 * 1024
    return 64 * 1024 * 1024  # v7x per-core VMEM / conservative default


# --------------------------------------------------------------------------- #
# Kernels
# --------------------------------------------------------------------------- #
def _ffn_kernel_accum_out(coupling_ref, x_ref, w1_ref, b1_ref, w2_ref, b2_ref,
                          o_ref):
    """f32-output variant: accumulate directly into the resident output block."""
    k = pl.program_id(1)

    @pl.when(k == 0)
    def _():
        o_ref[...] = jnp.zeros_like(o_ref)

    # Hidden slab for this d_ff tile: relu(x @ W1[:, k] + b1[k]).
    h = jnp.dot(x_ref[...], w1_ref[...], preferred_element_type=jnp.float32)
    h = jnp.maximum(h + b1_ref[...].astype(jnp.float32), 0.0)

    # Second matmul, accumulated across d_ff tiles into the output block.
    o_ref[...] += jnp.dot(h.astype(w2_ref.dtype), w2_ref[...],
                          preferred_element_type=jnp.float32)

    @pl.when(k == pl.num_programs(1) - 1)
    def _():
        coupling = coupling_ref[0, 0]          # sigmoid precomputed in wrapper
        o_ref[...] = coupling * o_ref[...] + b2_ref[...].astype(jnp.float32)


def _ffn_kernel_scratch(coupling_ref, x_ref, w1_ref, b1_ref, w2_ref, b2_ref,
                        o_ref, acc_ref):
    """Generic-output variant: f32 VMEM scratch accumulator, cast at the end."""
    k = pl.program_id(1)

    @pl.when(k == 0)
    def _():
        acc_ref[...] = jnp.zeros_like(acc_ref)

    h = jnp.dot(x_ref[...], w1_ref[...], preferred_element_type=jnp.float32)
    h = jnp.maximum(h + b1_ref[...].astype(jnp.float32), 0.0)
    acc_ref[...] += jnp.dot(h.astype(w2_ref.dtype), w2_ref[...],
                            preferred_element_type=jnp.float32)

    @pl.when(k == pl.num_programs(1) - 1)
    def _():
        coupling = coupling_ref[0, 0]
        out = coupling * acc_ref[...] + b2_ref[...].astype(jnp.float32)
        o_ref[...] = out.astype(o_ref.dtype)


# --------------------------------------------------------------------------- #
# Wrappers
# --------------------------------------------------------------------------- #
def prepare_quantum_ffn_params(w1, b1, w2, b2, quantum_coupling, *,
                               tk=512, compute_dtype=jnp.bfloat16):
    """Pad / cast weights once (cache the result across calls).

    w1: (d_model, d_ff)   [pre-transposed from torch's (d_ff, d_model)]
    b1: (d_ff,)
    w2: (d_ff, d_model)   [pre-transposed from torch's (d_model, d_ff)]
    b2: (d_model,)
    quantum_coupling: scalar parameter (pre-sigmoid).
    """
    d_model, d_ff = w1.shape
    assert w2.shape == (d_ff, d_model)

    # MXU-friendly alignment: 256 (v6e/v7x systolic tile) when dims allow,
    # 128 otherwise (keeps tiny configs tight; v5e MXU is 128x128).
    dm_align = 256 if d_model >= 256 else 128
    ff_align = 256 if d_ff >= 256 else 128

    dm_p = _round_up(d_model, dm_align)
    tk_eff = _round_up(min(tk, _round_up(d_ff, ff_align)), ff_align)
    df_p = _round_up(d_ff, tk_eff)

    w1_p = jnp.pad(w1, ((0, dm_p - d_model), (0, df_p - d_ff))).astype(compute_dtype)
    w2_p = jnp.pad(w2, ((0, df_p - d_ff), (0, dm_p - d_model))).astype(compute_dtype)
    b1_p = jnp.pad(b1.reshape(1, d_ff),
                   ((0, 0), (0, df_p - d_ff))).astype(jnp.float32)
    b2_p = jnp.pad(b2.reshape(1, d_model),
                   ((0, 0), (0, dm_p - d_model))).astype(jnp.float32)

    # sigmoid hoisted out of the kernel (single scalar, SMEM).
    coupling = jax.nn.sigmoid(jnp.asarray(quantum_coupling, jnp.float32))
    coupling = coupling.reshape(1, 1)

    return dict(w1_p=w1_p, b1_p=b1_p, w2_p=w2_p, b2_p=b2_p, coupling=coupling,
                d_model=int(d_model), d_ff=int(d_ff),
                dm_p=int(dm_p), tk_eff=int(tk_eff), df_p=int(df_p),
                compute_dtype=jnp.dtype(compute_dtype))


def quantum_ffn(x, params, *, tm=None):
    """QuantumEnhancedFeedForward forward pass.  x: (batch, seq, d_model)."""
    batch, seq, d_model = x.shape
    assert d_model == params["d_model"]
    dm_p, tk_eff, df_p = params["dm_p"], params["tk_eff"], params["df_p"]
    compute_dtype = params["compute_dtype"]
    M = batch * seq

    vmem_cap = _tpu_vmem_capacity_bytes()
    vmem_limit = max(32 * 1024 * 1024,
                     min(vmem_cap - 12 * 1024 * 1024, int(0.85 * vmem_cap)))

    # M-tile default: 128 MiB chips (v5e/v6e) need big row tiles to escape the
    # weight-stream-bound regime; 64 MiB chips (v7x) get smaller tiles.
    if tm is None:
        tm = 768 if vmem_cap >= (100 << 20) else 256

    tm_eff = min(tm, _round_up(M, 8))
    # On 2-TensorCore chips (v7x) make sure the "parallel" axis has >= 2 tiles.
    if vmem_cap < (100 << 20):
        if _round_up(M, tm_eff) // tm_eff == 1 and tm_eff >= 16:
            tm_eff = _round_up(tm_eff // 2, 8)
    M_p = _round_up(M, tm_eff)
    grid_m = M_p // tm_eff
    grid_k = df_p // tk_eff

    # Per-call work: pad + cast x only (weights were prepared once).
    x2d = x.reshape(M, d_model)
    x_p = jnp.pad(x2d, ((0, M_p - M), (0, dm_p - d_model))).astype(compute_dtype)

    out_dtype = jnp.dtype(x.dtype)
    if out_dtype == jnp.dtype(jnp.float32):
        kernel = _ffn_kernel_accum_out
        scratch_shapes = []                                  # accumulate in o_ref
    else:
        kernel = _ffn_kernel_scratch
        scratch_shapes = [pltpu.VMEM((tm_eff, dm_p), jnp.float32)]

    c_size = jnp.dtype(compute_dtype).itemsize
    o_size = out_dtype.itemsize
    cost = pl.CostEstimate(
        flops=int(4 * M_p * dm_p * df_p),                    # two matmuls
        transcendentals=0,
        bytes_accessed=int(
            c_size * M_p * dm_p                              # x
            + grid_m * c_size * (dm_p * df_p + df_p * dm_p)  # W1/W2 per M tile
            + grid_m * 4 * (df_p + dm_p)                     # biases per M tile
            + o_size * M_p * dm_p))                          # out

    out_p = pl.pallas_call(
        kernel,
        out_shape=jax.ShapeDtypeStruct((M_p, dm_p), out_dtype),
        grid=(grid_m, grid_k),
        in_specs=[
            pl.BlockSpec(memory_space=pltpu.MemorySpace.SMEM),    # coupling
            pl.BlockSpec((tm_eff, dm_p), lambda i, k: (i, 0)),    # x tile
            pl.BlockSpec((dm_p, tk_eff), lambda i, k: (0, k)),    # W1 slab
            pl.BlockSpec((1, tk_eff), lambda i, k: (0, k)),       # b1 slab
            pl.BlockSpec((tk_eff, dm_p), lambda i, k: (k, 0)),    # W2 slab
            pl.BlockSpec((1, dm_p), lambda i, k: (0, 0)),         # b2
        ],
        out_specs=pl.BlockSpec((tm_eff, dm_p), lambda i, k: (i, 0)),
        scratch_shapes=scratch_shapes,
        compiler_params=pltpu.CompilerParams(
            dimension_semantics=("parallel", "arbitrary"),
            vmem_limit_bytes=int(vmem_limit)),
        cost_estimate=cost,
    )(params["coupling"], x_p, params["w1_p"], params["b1_p"],
      params["w2_p"], params["b2_p"])

    return out_p[:M, :d_model].reshape(batch, seq, d_model)


# --------------------------------------------------------------------------- #
# References & demo
# --------------------------------------------------------------------------- #
def _init_linear(key, fan_in, fan_out):
    # Mimic torch.nn.Linear default init: U(-1/sqrt(fan_in), 1/sqrt(fan_in)).
    kw, kb = jax.random.split(key)
    bound = 1.0 / (fan_in ** 0.5)
    w = jax.random.uniform(kw, (fan_out, fan_in), jnp.float32, -bound, bound)
    b = jax.random.uniform(kb, (fan_out,), jnp.float32, -bound, bound)
    return w, b


def _reference_f32(x, w1, b1, w2, b2, qc):
    c = jax.nn.sigmoid(jnp.float32(qc))
    h = jnp.maximum(x @ w1 + b1, 0.0) * c     # original module ordering
    return h @ w2 + b2


def _reference_matched(x, w1, b1, w2, b2, qc, compute_dtype):
    # Same math with operands cast to compute_dtype and f32 accumulation.
    c = jax.nn.sigmoid(jnp.float32(qc))
    h = jnp.dot(x.astype(compute_dtype), w1.astype(compute_dtype),
                preferred_element_type=jnp.float32)
    h = jnp.maximum(h + b1.astype(jnp.float32), 0.0)
    out = c * jnp.dot(h.astype(compute_dtype), w2.astype(compute_dtype),
                      preferred_element_type=jnp.float32)
    out = out + b2.astype(jnp.float32)
    return out.astype(x.dtype)


if __name__ == "__main__":
    quantum_coupling_param = 0.99999   # nn.Parameter(tensor(config.quantum_coupling))
    key = jax.random.PRNGKey(0)

    # --- test 1: small config, default bf16 MXU operands, f32 in/out ---------
    batch, seq, d_model, d_ff = 2, 8, 32, 64
    kx, k1, k2, key = jax.random.split(key, 4)
    x = jax.random.normal(kx, (batch, seq, d_model), jnp.float32)
    w1_t, b1 = _init_linear(k1, d_model, d_ff)        # torch layout (out, in)
    w2_t, b2 = _init_linear(k2, d_ff, d_model)
    w1, w2 = w1_t.T, w2_t.T                           # kernel layout (in, out)

    params = prepare_quantum_ffn_params(w1, b1, w2, b2, quantum_coupling_param)
    out = jax.block_until_ready(quantum_ffn(x, params))
    ref_m = _reference_matched(x, w1, b1, w2, b2, quantum_coupling_param,
                               jnp.bfloat16)
    ref_f = _reference_f32(x, w1, b1, w2, b2, quantum_coupling_param)
    assert jnp.allclose(out, ref_m, atol=1e-3, rtol=1e-3), "mismatch (test 1 matched)"
    assert jnp.allclose(out, ref_f, atol=5e-2, rtol=5e-2), "mismatch (test 1 f32 ref)"

    # --- test 2: multi-tile M, d_ff reduction, padding, exact f32 compute ----
    batch, seq, d_model, d_ff = 2, 72, 48, 200
    kx, k1, k2, key = jax.random.split(key, 4)
    x = jax.random.normal(kx, (batch, seq, d_model), jnp.float32)
    w1_t, b1 = _init_linear(k1, d_model, d_ff)
    w2_t, b2 = _init_linear(k2, d_ff, d_model)
    w1, w2 = w1_t.T, w2_t.T

    params = prepare_quantum_ffn_params(w1, b1, w2, b2, quantum_coupling_param,
                                        tk=128, compute_dtype=jnp.float32)
    out = jax.block_until_ready(quantum_ffn(x, params, tm=128))
    ref_f = _reference_f32(x, w1, b1, w2, b2, quantum_coupling_param)
    assert jnp.allclose(out, ref_f, atol=1e-4, rtol=1e-4), "mismatch (test 2)"

    # --- test 3: bf16 activations in/out (scratch-accumulator kernel path) ---
    batch, seq, d_model, d_ff = 1, 16, 64, 128
    kx, k1, k2, key = jax.random.split(key, 4)
    x = jax.random.normal(kx, (batch, seq, d_model), jnp.float32).astype(jnp.bfloat16)
    w1_t, b1 = _init_linear(k1, d_model, d_ff)
    w2_t, b2 = _init_linear(k2, d_ff, d_model)
    w1, w2 = w1_t.T, w2_t.T

    params = prepare_quantum_ffn_params(w1, b1, w2, b2, quantum_coupling_param)
    out = jax.block_until_ready(quantum_ffn(x, params))
    ref_m = _reference_matched(x, w1, b1, w2, b2, quantum_coupling_param,
                               jnp.bfloat16)
    assert jnp.allclose(out.astype(jnp.float32), ref_m.astype(jnp.float32),
                        atol=1e-2, rtol=1e-2), "mismatch (test 3)"

    print("KERNEL_OK")
</pallas_src>

<mosaic_0001>
module attributes {stable_mosaic.version = 11 : i64} {
  func.func @_ffn_kernel_accum_out(%arg0: i32, %arg1: i32, %arg2: memref<1x1xf32, #tpu.memory_space<smem>>, %arg3: memref<8x128xbf16, #tpu.memory_space<vmem>>, %arg4: memref<128x128xbf16, #tpu.memory_space<vmem>>, %arg5: memref<1x128xf32, #tpu.memory_space<vmem>>, %arg6: memref<128x128xbf16, #tpu.memory_space<vmem>>, %arg7: memref<1x128xf32, #tpu.memory_space<vmem>>, %arg8: memref<8x128xf32, #tpu.memory_space<vmem>>) attributes {dimension_semantics = [#tpu.dimension_semantics<parallel>, #tpu.dimension_semantics<arbitrary>], iteration_bounds = array<i64: 2, 1>, scalar_prefetch = 0 : i64, scratch_operands = 0 : i64, tpu.core_type = #tpu.core_type<tc>, window_params = [{transform_indices = @transform_0, window_bounds = array<i64: 1, 1>}, {transform_indices = @transform_1, window_bounds = array<i64: 8, 128>}, {transform_indices = @transform_2, window_bounds = array<i64: 128, 128>}, {transform_indices = @transform_3, window_bounds = array<i64: 1, 128>}, {transform_indices = @transform_4, window_bounds = array<i64: 128, 128>}, {pipeline_mode = #tpu.pipeline_mode<synchronous>, transform_indices = @transform_5, window_bounds = array<i64: 1, 128>}, {transform_indices = @transform_6, window_bounds = array<i64: 8, 128>}]} {
    %c0_i32 = arith.constant 0 : i32
    %0 = arith.cmpi eq, %arg1, %c0_i32 : i32
    %1 = arith.extui %0 : i1 to i32
    %c0_i32_0 = arith.constant 0 : i32
    %2 = arith.cmpi ne, %1, %c0_i32_0 : i32
    scf.if %2 {
      %cst_16 = arith.constant 0.000000e+00 : f32
      %20 = vector.broadcast %cst_16 : f32 to vector<8x128xf32>
      %c0_17 = arith.constant 0 : index
      %c0_18 = arith.constant 0 : index
      %21 = vector.load %arg8[%c0_17, %c0_18] : memref<8x128xf32, #tpu.memory_space<vmem>>, vector<8x128xf32>
      tpu.vector_store %arg8[%c0_17, %c0_18], %20 {strides = array<i32>} : memref<8x128xf32, #tpu.memory_space<vmem>>, vector<8x128xf32>,
    } else {
    }
    %c0 = arith.constant 0 : index
    %c0_1 = arith.constant 0 : index
    %3 = vector.load %arg3[%c0, %c0_1] : memref<8x128xbf16, #tpu.memory_space<vmem>>, vector<8x128xbf16>
    %c0_2 = arith.constant 0 : index
    %c0_3 = arith.constant 0 : index
    %4 = vector.load %arg4[%c0_2, %c0_3] : memref<128x128xbf16, #tpu.memory_space<vmem>>, vector<128x128xbf16>
    %cst = arith.constant dense<0.000000e+00> : vector<8x128xf32>
    %5 = tpu.matmul %3, %4, %cst {dimension_numbers = #tpu.dot_dimension_numbers<[1], [0], [0], [1], [0, 0, 1, 1], [], []>} : vector<8x128xbf16>, vector<128x128xbf16>, vector<8x128xf32> -> vector<8x128xf32>
    %c0_4 = arith.constant 0 : index
    %c0_5 = arith.constant 0 : index
    %6 = vector.load %arg5[%c0_4, %c0_5] : memref<1x128xf32, #tpu.memory_space<vmem>>, vector<1x128xf32>
    %7 = vector.broadcast %6 : vector<1x128xf32> to vector<8x128xf32>
    %8 = arith.addf %5, %7 : vector<8x128xf32>
    %cst_6 = arith.constant 0.000000e+00 : f32
    %9 = vector.broadcast %cst_6 : f32 to vector<8x128xf32>
    %10 = arith.maximumf %8, %9 : vector<8x128xf32>
    %c0_7 = arith.constant 0 : index
    %c0_8 = arith.constant 0 : index
    %11 = vector.load %arg8[%c0_7, %c0_8] : memref<8x128xf32, #tpu.memory_space<vmem>>, vector<8x128xf32>
    %12 = arith.truncf %10 : vector<8x128xf32> to vector<8x128xbf16>
    %c0_9 = arith.constant 0 : index
    %c0_10 = arith.constant 0 : index
    %13 = vector.load %arg6[%c0_9, %c0_10] : memref<128x128xbf16, #tpu.memory_space<vmem>>, vector<128x128xbf16>
    %cst_11 = arith.constant dense<0.000000e+00> : vector<8x128xf32>
    %14 = tpu.matmul %12, %13, %cst_11 {dimension_numbers = #tpu.dot_dimension_numbers<[1], [0], [0], [1], [0, 0, 1, 1], [], []>} : vector<8x128xbf16>, vector<128x128xbf16>, vector<8x128xf32> -> vector<8x128xf32>
    %15 = arith.addf %11, %14 : vector<8x128xf32>
    %c0_12 = arith.constant 0 : index
    %c0_13 = arith.constant 0 : index
    %16 = vector.load %arg8[%c0_12, %c0_13] : memref<8x128xf32, #tpu.memory_space<vmem>>, vector<8x128xf32>
    tpu.vector_store %arg8[%c0_12, %c0_13], %15 {strides = array<i32>} : memref<8x128xf32, #tpu.memory_space<vmem>>, vector<8x128xf32>,
    %c0_i32_14 = arith.constant 0 : i32
    %17 = arith.cmpi eq, %arg1, %c0_i32_14 : i32
    %18 = arith.extui %17 : i1 to i32
    %c0_i32_15 = arith.constant 0 : i32
    %19 = arith.cmpi ne, %18, %c0_i32_15 : i32
    scf.if %19 {
      %c0_16 = arith.constant 0 : index
      %c0_17 = arith.constant 0 : index
      %20 = memref.load %arg2[%c0_16, %c0_17] : memref<1x1xf32, #tpu.memory_space<smem>>
      %c0_18 = arith.constant 0 : index
      %c0_19 = arith.constant 0 : index
      %21 = vector.load %arg8[%c0_18, %c0_19] : memref<8x128xf32, #tpu.memory_space<vmem>>, vector<8x128xf32>
      %22 = vector.broadcast %20 : f32 to vector<8x128xf32>
      %23 = arith.mulf %22, %21 : vector<8x128xf32>
      %c0_20 = arith.constant 0 : index
      %c0_21 = arith.constant 0 : index
      %24 = vector.load %arg7[%c0_20, %c0_21] : memref<1x128xf32, #tpu.memory_space<vmem>>, vector<1x128xf32>
      %25 = vector.broadcast %24 : vector<1x128xf32> to vector<8x128xf32>
      %26 = arith.addf %23, %25 : vector<8x128xf32>
      %c0_22 = arith.constant 0 : index
      %c0_23 = arith.constant 0 : index
      %27 = vector.load %arg8[%c0_22, %c0_23] : memref<8x128xf32, #tpu.memory_space<vmem>>, vector<8x128xf32>
      tpu.vector_store %arg8[%c0_22, %c0_23], %26 {strides = array<i32>} : memref<8x128xf32, #tpu.memory_space<vmem>>, vector<8x128xf32>,
    } else {
    }
    return
  }
  func.func @transform_0(%arg0: i32, %arg1: i32) -> (i32, i32) {
    %c0_i32 = arith.constant 0 : i32
    %c0_i32_0 = arith.constant 0 : i32
    %c0_i32_1 = arith.constant 0 : i32
    return %c0_i32, %c0_i32_0 : i32, i32
  }
  func.func @transform_1(%arg0: i32, %arg1: i32) -> (i32, i32) {
    %c0_i32 = arith.constant 0 : i32
    %c0_i32_0 = arith.constant 0 : i32
    return %arg0, %c0_i32 : i32, i32
  }
  func.func @transform_2(%arg0: i32, %arg1: i32) -> (i32, i32) {
    %c0_i32 = arith.constant 0 : i32
    %c0_i32_0 = arith.constant 0 : i32
    return %c0_i32, %arg1 : i32, i32
  }
  func.func @transform_3(%arg0: i32, %arg1: i32) -> (i32, i32) {
    %c0_i32 = arith.constant 0 : i32
    %c0_i32_0 = arith.constant 0 : i32
    return %c0_i32, %arg1 : i32, i32
  }
  func.func @transform_4(%arg0: i32, %arg1: i32) -> (i32, i32) {
    %c0_i32 = arith.constant 0 : i32
    %c0_i32_0 = arith.constant 0 : i32
    return %arg1, %c0_i32 : i32, i32
  }
  func.func @transform_5(%arg0: i32, %arg1: i32) -> (i32, i32) {
    %c0_i32 = arith.constant 0 : i32
    %c0_i32_0 = arith.constant 0 : i32
    %c0_i32_1 = arith.constant 0 : i32
    return %c0_i32, %c0_i32_0 : i32, i32
  }
  func.func @transform_6(%arg0: i32, %arg1: i32) -> (i32, i32) {
    %c0_i32 = arith.constant 0 : i32
    %c0_i32_0 = arith.constant 0 : i32
    return %arg0, %c0_i32 : i32, i32
  }
}

</mosaic_0001>

<bundles_post_ra>
// kernel: tpu_custom_call.1
= control target key start
LH: loop header
LB: loop body
LE: loop exit
PB: predicated region body
PF: predicated region fallthrough
CT: control target
= control target key end

     0   :  { %s1386_s0 = inlined_call_operand.<no memory space> [shape: f32[1,1], index: 0, kind: input, shape index: {}]   ;;  %s1387_s1 = inlined_call_operand.hbm [shape: bf16[16,128], index: 1, kind: input, shape index: {}]   ;;  %s1388_s2 = inlined_call_operand.hbm [shape: bf16[128,128], index: 2, kind: input, shape index: {}]   ;;  %s1389_s3 = inlined_call_operand.vmem [shape: f32[1,128], index: 3, kind: input, shape index: {}]   ;;  %s1390_s4 = inlined_call_operand.hbm [shape: bf16[128,128], index: 4, kind: input, shape index: {}]   ;;  %s1391_s5 = inlined_call_operand.vmem [shape: f32[1,128], index: 5, kind: input, shape index: {}]   ;;  %s1392_s6 = inlined_call_operand.hbm [shape: f32[16,128], index: 6, kind: output, shape index: {}]  }
   0x1   :  { %11 = sst [smem:[#allocation2]] %s1386_s0 }
   0x2   :  { %12 = vsyncpa [#allocation4], 0 }
   0x3   :  { %14 = vsyncpa [#allocation4 + $0x1], 0 }
   0x4   :  { %15 = vsyncpa [#allocation7], 0 }
   0x5   :  { %16 = vsyncpa [#allocation5], 0 }
   0x6   :  { %18 = vsyncpa [#allocation5 + $0x1], 0  ;;  %s1126_s23 = smov 0   ;;  %s1128_s24 = smov 0  }
   0x7   :  { %s1130_s25 = smov 0   ;;  %s1132_s26 = smov 0  }
   0x8   :  { %s1134_s27 = smov 0   ;;  %s1136_s28 = smov 0  }
   0x9 LB: > { %s709_s0 = sadd.s32 4294967295, %s1078_s28   ;;  %s710_s29 = sadd.s32 4294967294, %s1078_s28   ;;  %s1078_s28 = sphi %s1136_s28, %s24_s28   ;;  %s1074_s27 = sphi %s1134_s27, %s1414_s27   ;;  %s1070_s26 = sphi %s1132_s26, %s1413_s26   ;;  %s1066_s25 = sphi %s1130_s25, %s1412_s25   ;;  %s1062_s24 = sphi %s1128_s24, %s1411_s24   ;;  %s1058_s23 = sphi %s1126_s23, %s1410_s23  }
   0xa   : > { %p77_p0 = scmp.ne.s32.totalorder %s1062_s24, %s1058_s23  ;;  %p1160_p1 = scmp.eq.s32.totalorder %s709_s0, 0 }
   0xb   : > { %p1164_p2 = scmp.eq.s32.totalorder %s709_s0, 1  ;;  %p206_p3 = scmp.eq.s32.totalorder %s710_s29, 1 }
   0xc   : > { %s1397_s30 = scalar_select %p1160_p1, 1, 0 }
   0xd   : > { %p1170_p4 = por %p1160_p1, %p77_p0  ;;  %p711_p5 = scmp.ge.s32.totalorder %s1078_s28, 1 }
   0xe   : > { %p1175_p6 = por %p206_p3, %p77_p0  ;;  %p213_p7 = scmp.lt.s32.totalorder %s1078_s28, 3 }
   0xf   : > { %s1399_s8 = scalar_select %p1170_p4, 1, 0 }
  0x10   : > { %s1400_s9 = scalar_select %p1175_p6, 1, 0 }
  0x11   : > { %p1180_p8 = pnand %p711_p5, %p213_p7  ;;  %s1080_s11 = smov [#allocation6]  }
  0x12   : > { %s230_s12 = sshll.u32 %s1080_s11, 4  ;;  %s1081_s14 = smov [#allocation8]   ;;  %s1184_s12 = int_to_ptr.vmem [resolvable:$true] %s230_s12 }
  0x13   : > { %p815_p9 = pneg %p1180_p8  ;;  %s252_s15 = sshll.u32 %s1081_s14, 4  ;;  %s1195_s15 = int_to_ptr.vmem [resolvable:$true] %s252_s15 }
  0x14   : > { %s906_s18 = scalar_lea.hbm %s1388_s2, 1024 }
  0x15   : > { %p1191_p11 = pnand %p815_p9, %p1160_p1  ;;  %p907_p12 = scmp.ne.s32.totalorder %s1388_s2, %s906_s18 }
  0x16   : > { %p913_p5 = scmp.lt.u32.totalorder %s906_s18, %s1388_s2 }
  0x17   : > { %p908_p13 = pneg %p1191_p11 }
  0x19   : > { %p909_p0 = pnand %p908_p13, %p907_p12 }
  0x1b   : > { %p910_p3 = pneg %p909_p0 }
  0x1d   : > { %p915_p7 = pnand %p913_p5, %p910_p3 }
  0x1f   : > { %918 = shalt.err (!%p915_p7)
}
  0x20   : > { %s919_s0 = scalar_lea.vmem %s1184_s12, 1024  ;;  %p927_p1 = scmp.lt.s32.totalorder %s1184_s12, %s1184_s12 }
  0x21   : > { %p920_p9 = scmp.ne.s32.totalorder %s1184_s12, %s919_s0  ;;  %p928_p12 = scmp.lt.s32.totalorder %s919_s0, %s919_s0 }
  0x23   : > { %p922_p10 = pnand %p920_p9, %p908_p13  ;;  %p929_p0 = por %p928_p12, %p927_p1 }
  0x25   : > { %p923_p6 = pneg %p922_p10 }
  0x27   : > { %p930_p4 = pnand %p929_p0, %p923_p6 }
  0x29   : > { %933 = shalt.err (!%p930_p4)
}
  0x2a   : > { %s1082_s29 = smov 64   ;;  %s1083_s11 = smov 4  }
  0x2b   : > { %818 = dma.hbm_to_vmem [thread:$0]  (!%p1191_p11), %s1388_s2, 1024, %s1184_s12, [#allocation7], %s1082_s29, %s1082_s29, %s1083_s11  }
  0x2c   : > { %s934_s19 = scalar_lea.hbm %s1390_s4, 1024 }
  0x2d   : > { %p935_p1 = scmp.ne.s32.totalorder %s1390_s4, %s934_s19  ;;  %p941_p10 = scmp.lt.u32.totalorder %s934_s19, %s1390_s4 }
  0x2f   : > { %p937_p4 = pnand %p935_p1, %p908_p13 }
  0x31   : > { %p938_p6 = pneg %p937_p4 }
  0x33   : > { %p943_p3 = pnand %p941_p10, %p938_p6 }
  0x35   : > { %946 = shalt.err (!%p943_p3)
}
  0x36   : > { %s947_s12 = scalar_lea.vmem %s1195_s15, 1024  ;;  %p955_p12 = scmp.lt.s32.totalorder %s1195_s15, %s1195_s15 }
  0x37   : > { %p948_p5 = scmp.ne.s32.totalorder %s1195_s15, %s947_s12  ;;  %p956_p0 = scmp.lt.s32.totalorder %s947_s12, %s947_s12 }
  0x39   : > { %p950_p7 = pnand %p948_p5, %p908_p13  ;;  %p957_p1 = por %p956_p0, %p955_p12 }
  0x3b   : > { %p951_p9 = pneg %p950_p7 }
  0x3d   : > { %p958_p4 = pnand %p957_p1, %p951_p9 }
  0x3f   : > { %961 = shalt.err (!%p958_p4)
}
  0x40   : > { %821 = dma.hbm_to_vmem [thread:$0]  (!%p1191_p11), %s1390_s4, 1024, %s1195_s15, [#allocation7], %s1082_s29, %s1082_s29, %s1083_s11  }
  0x41   : > { %s36_s17 = sadd.s32 1, %s1074_s27  ;;  %s64_s18 = sadd.s32 1, %s1066_s25 }
  0x42   : > { %p38_p13 = scmp.ge.s32.totalorder %s36_s17, 2  ;;  %p71_p6 = scmp.ne.s32.totalorder %s1066_s25, %s1062_s24 }
  0x43   : > { %p72_p10 = scmp.eq.s32.totalorder %s1078_s28, 0  ;;  %p832_p3 = scmp.lt.s32.totalorder %s1078_s28, 2 }
  0x44   : > { %s1416_s17 = smov (%p38_p13, %s36_s17), 0  ;;  %p1259_p7 = por %p1164_p2, %p71_p6 }
  0x45   : > { %p73_p5 = por %p72_p10, %p71_p6  ;;  %s61_s19 = ssub.s32 %s1074_s27, %s1416_s17 }
  0x46   : > { %s1403_s13 = scalar_select %p1259_p7, 1, 0 }
  0x47   : > { %s269_s20 = sand.u32 1, %s1066_s25   ;;  %p62_p9 = scmp.eq.s32.totalorder %s61_s19, 0 }
  0x48   : > { %s716_s15 = sshll.u32 %s269_s20, 2  ;;  %s717_s29 = sshll.u32 %s1074_s27, 6 }
  0x49   : > { %s1268_s11 = scalar_select %p62_p9, %s1066_s25, %s64_s18  }
  0x4a   : > { %s1273_s0 = scalar_lea.hbm %s1387_s1, %s717_s29  ;;  %s273_s7 = scalar_lea.vmem [#allocation3], %s716_s15 }
  0x4b   : > { %s280_s12 = sshll.u32 %s273_s7, 4  ;;  %p1277_p2 = pnand %p832_p3, %p73_p5  ;;  %s1281_s12 = int_to_ptr.vmem [resolvable:$true] %s280_s12 }
  0x4c   : > { %s270_s16 = scalar_lea.sflag [#allocation4], %s269_s20  ;;  %s962_s18 = scalar_lea.hbm %s1273_s0, 64 }
  0x4d   : > { %p963_p11 = scmp.ne.s32.totalorder %s1273_s0, %s962_s18  ;;  %p964_p12 = pneg %p1277_p2 }
  0x4e   : > { %s967_s29 = scalar_lea.hbm %s1387_s1, 128  ;;  %p968_p4 = scmp.lt.u32.totalorder %s1273_s0, %s1387_s1 }
  0x4f   : > { %p965_p0 = pnand %p964_p12, %p963_p11  ;;  %p969_p13 = scmp.lt.u32.totalorder %s967_s29, %s962_s18 }
  0x50   : > { %p971_p10 = scmp.lt.u32.totalorder %s962_s18, %s1273_s0 }
  0x51   : > { %p966_p1 = pneg %p965_p0  ;;  %p970_p6 = por %p969_p13, %p968_p4 }
  0x53   : > { %p972_p3 = por %p971_p10, %p970_p6 }
  0x55   : > { %p973_p5 = pnand %p972_p3, %p966_p1 }
  0x57   : > { %976 = shalt.err (!%p973_p5)
}
  0x58   : > { %s977_s20 = scalar_lea.vmem %s1281_s12, 64  ;;  %s1084_s7 = smov [#allocation3]  }
  0x59   : > { %p978_p9 = scmp.ne.s32.totalorder %s1281_s12, %s977_s20  ;;  %s982_s19 = sshll.u32 %s1084_s7, 4  ;;  %s983_s19 = int_to_ptr.vmem [resolvable:$false] %s982_s19 }
  0x5a   : > { %s984_s15 = scalar_lea.vmem %s983_s19, 128  ;;  %p985_p7 = scmp.lt.s32.totalorder %s1281_s12, %s983_s19 }
  0x5b   : > { %p980_p11 = pnand %p978_p9, %p964_p12  ;;  %p986_p4 = scmp.lt.s32.totalorder %s984_s15, %s977_s20 }
  0x5d   : > { %p981_p0 = pneg %p980_p11  ;;  %p987_p13 = por %p986_p4, %p985_p7 }
  0x5f   : > { %p988_p6 = pnand %p987_p13, %p981_p0 }
  0x61   : > { %991 = shalt.err (!%p988_p6)
}
  0x62   : > { %825 = dma.hbm_to_vmem [thread:$0]  (!%p1277_p2), %s1273_s0, 64, %s1281_s12, %s270_s16  }
  0x63   : > { %289 = sbr.rel (%p1180_p8) target bundleno = 592 (0x250), region = 44  ;;  %s1311_s18 = sand.u32 (!%p1180_p8), 1, %s1062_s24  }
  0x64   : > { %s719_s29 = sshll.u32 (!%p1180_p8), %s1311_s18, 2  ;;  %s292_s21 = scalar_lea.sflag (!%p1180_p8), [#allocation4], %s1311_s18 }
  0x65   : > { %s1315_s22 = scalar_lea.vmem (!%p1180_p8), [#allocation3], %s719_s29  ;;  %p1405_p7 = scmp.ne.s32.totalorder (!%p1180_p8), %s1399_s8, 0 }
  0x6a   : > { %1045 = dma.done.wait (%p1405_p7), %s292_s21, 64  }
  0x6b   : > { %1047 = vsyncadd (%p1405_p7), %s292_s21, 4294967232  ;;  %p1406_p2 = scmp.ne.s32.totalorder %s1397_s30, 0 }
  0x6d   : > { %1049 = dma.done.wait (%p1406_p2), [#allocation7], 2048  }
  0x6e   : > { %1051 = vsyncadd (%p1406_p2), [#allocation7], 4294965248  ;;  %v1085_v0 = vmov 0.0   ;;  %vm1086_vm0 = vmmov 0   ;;  %v890_v1 = vld [vmem:[#allocation6] sm:$0xff]   ;;  %v891_v2 = vld [vmem:[#allocation6 + $0x8] sm:$0xff]  }
  0x6f   : > { %763 = vmatprep.subr.bf16.mxu0 %v1085_v0  ;;  %779 = vmatprep.mubr.msk.bf16.mxu0 %vm1086_vm0, %v1085_v0  ;;  %v892_v3 = vld [vmem:[#allocation6 + $0x10] sm:$0xff]   ;;  %v898_v4 = vld [vmem:[#allocation8] sm:$0xff]   ;;  %v893_v5 = vld [vmem:[#allocation6 + $0x18] sm:$0xff]   ;;  %s569_s10 = sld [smem:[#allocation2]]  ;;  %s722_s0 = sshll.u32 %s1311_s18, 3 }
  0x70   : > { %783 = vmatprep.subr.bf16.mxu1 %v1085_v0  ;;  %799 = vmatprep.mubr.msk.bf16.mxu1 %vm1086_vm0, %v1085_v0  ;;  %v899_v6 = vld [vmem:[#allocation8 + $0x8] sm:$0xff]   ;;  %v894_v7 = vld [vmem:[#allocation6 + $0x20] sm:$0xff]   ;;  %v900_v8 = vld [vmem:[#allocation8 + $0x10] sm:$0xff]   ;;  %s742_s16 = sshll.u32 %s1070_s26, 7  ;;  %s334_s20 = scalar_lea.vmem [#allocation9], %s722_s0 }
  0x71   : > { %764 = vmatpush3.bf16.msra.mxu0 %v890_v1  ;;  %784 = vmatpush3.bf16.msra.mxu1 %v898_v4  ;;  %v895_v9 = vld [vmem:[#allocation6 + $0x28] sm:$0xff]   ;;  %v901_v10 = vld [vmem:[#allocation8 + $0x18] sm:$0xff]   ;;  %v896_v11 = vld [vmem:[#allocation6 + $0x30] sm:$0xff]   ;;  %s596_s7 = sshll.u32 %s334_s20, 4  ;;  %s1337_s29 = scalar_lea.hbm %s1392_s6, %s742_s16  ;;  %s1339_s7 = int_to_ptr.vmem [resolvable:$true] %s596_s7 }
  0x72   : > { %765 = vmatprep.subr.bf16.mxu0 %v1085_v0  ;;  %785 = vmatprep.subr.bf16.mxu1 %v1085_v0  ;;  %v902_v12 = vld [vmem:[#allocation8 + $0x20] sm:$0xff]   ;;  %v897_v13 = vld [vmem:[#allocation6 + $0x38] sm:$0xff]   ;;  %v903_v14 = vld [vmem:[#allocation8 + $0x28] sm:$0xff]   ;;  %s583_s21 = scalar_lea.sflag [#allocation5], %s1311_s18  ;;  %p1407_p12 = scmp.ne.s32.totalorder %s1403_s13, 0 }
  0x73   : > { %v345_v15 = vld [vmem:[%s1315_s22] sm:$0xf]  ;;  %v904_v16 = vld [vmem:[#allocation8 + $0x30] sm:$0xff]   ;;  %s992_s22 = scalar_lea.vmem %s1339_s7, 128  ;;  %s1087_s26 = smov [#allocation9]  }
  0x74   : > { %v905_v17 = vld [vmem:[#allocation8 + $0x38] sm:$0xff]   ;;  %p993_p8 = scmp.ne.s32.totalorder %s1339_s7, %s992_s22  ;;  %s996_s30 = sshll.u32 %s1087_s26, 4  ;;  %s997_s30 = int_to_ptr.vmem [resolvable:$false] %s996_s30 }
  0x75   : > { %766 = vmatpush3.bf16.msra.mxu0 %v891_v2  ;;  %786 = vmatpush3.bf16.msra.mxu1 %v899_v6  ;;  %v723_v18 = vld [vmem:[%s1389_s3] ss:$0 sm:$0xff]  ;;  %v571_v27 = vstv %s569_s10  ;;  %s998_s8 = scalar_lea.vmem %s997_s30, 256  ;;  %p999_p3 = scmp.lt.s32.totalorder %s1339_s7, %s997_s30 }
  0x76   : > { %767 = vmatprep.subr.bf16.mxu0 %v1085_v0  ;;  %787 = vmatprep.subr.bf16.mxu1 %v1085_v0  ;;  %v740_v30 = vld [vmem:[%s1391_s5] ss:$0 sm:$0xff]  ;;  %p994_p1 = pnand %p993_p8, %p1407_p12  ;;  %p1000_p5 = scmp.lt.s32.totalorder %s998_s8, %s992_s22 }
  0x78   : > { %p995_p10 = pneg %p994_p1  ;;  %p1001_p9 = por %p1000_p5, %p999_p3 }
  0x79   : > { %768 = vmatpush3.bf16.msra.mxu0 %v892_v3  ;;  %788 = vmatpush3.bf16.msra.mxu1 %v900_v8 }
  0x7a   : > { %769 = vmatprep.subr.bf16.mxu0 %v1085_v0  ;;  %789 = vmatprep.subr.bf16.mxu1 %v1085_v0  ;;  %p1002_p11 = pnand %p1001_p9, %p995_p10 }
  0x7d   : > { %770 = vmatpush3.bf16.msra.mxu0 %v893_v5  ;;  %790 = vmatpush3.bf16.msra.mxu1 %v901_v10 }
  0x7e   : > { %771 = vmatprep.subr.bf16.mxu0 %v1085_v0  ;;  %791 = vmatprep.subr.bf16.mxu1 %v1085_v0 }
  0x81   : > { %772 = vmatpush3.bf16.msra.mxu0 %v894_v7  ;;  %792 = vmatpush3.bf16.msra.mxu1 %v902_v12 }
  0x82   : > { %773 = vmatprep.subr.bf16.mxu0 %v1085_v0  ;;  %793 = vmatprep.subr.bf16.mxu1 %v1085_v0 }
  0x85   : > { %774 = vmatpush3.bf16.msra.mxu0 %v895_v9  ;;  %794 = vmatpush3.bf16.msra.mxu1 %v903_v14 }
  0x86   : > { %775 = vmatprep.subr.bf16.mxu0 %v1085_v0  ;;  %795 = vmatprep.subr.bf16.mxu1 %v1085_v0 }
  0x89   : > { %776 = vmatpush3.bf16.msra.mxu0 %v896_v11  ;;  %796 = vmatpush3.bf16.msra.mxu1 %v904_v16 }
  0x8a   : > { %777 = vmatprep.subr.bf16.mxu0 %v1085_v0  ;;  %797 = vmatprep.subr.bf16.mxu1 %v1085_v0 }
  0x8d   : > { %778 = vmatpush3.bf16.msra.mxu0 %v897_v13  ;;  %798 = vmatpush3.bf16.msra.mxu1 %v905_v17 }
  0x90   : > { %780 = vmatmul.mubr.bf16.vlgmr.msra.gmra.mrb[0].mxu0 %v345_v15 }
 0x163   : > { %v451_v19 = vpop.f32.mrb[0].mxu0 }
 0x164   : > { %v452_v20 = vadd.f32 %v723_v18, %v451_v19  ;;  %v781_v21 = vpop.f32.mrb[1].mxu0 }
 0x165   : > { %v454_v22 = vpop.f32.mrb[2].mxu0 }
 0x166   : > { %v457_v23 = vmax.f32 %v452_v20, 0.0  ;;  %v782_v24 = vpop.f32.mrb[3].mxu0 }
 0x168   : > { %v459_v25 = vpack.c.bf16 %v457_v23, %v457_v23 }
 0x16a   : > { %800 = vmatmul.mubr.bf16.vlgmr.msra.gmra.mrb[0].mxu1 %v459_v25 }
 0x23d   : > { %v558_v26 = vpop.f32.mrb[0].mxu1 }
 0x23e   : > { %v801_v28 = vpop.f32.mrb[1].mxu1  ;;  %v572_v32 = vmul.f32 %v571_v27, %v558_v26 }
 0x23f   : > { %v561_v29 = vpop.f32.mrb[2].mxu1 }
 0x240   : > { %v802_v31 = vpop.f32.mrb[3].mxu1  ;;  %v580_v33 = vadd.f32 %v740_v30, %v572_v32 }
 0x242   : > { %581 = vst [vmem:[%s334_s20] sm:$0xff] %v580_v33 }
 0x243   : > { %1005 = shalt.err (!%p1002_p11)
}
 0x244   : > { %s1006_s18 = scalar_lea.hbm %s1337_s29, 128  ;;  %s1010_s12 = scalar_lea.hbm %s1392_s6, 256 }
 0x245   : > { %p1007_p0 = scmp.ne.s32.totalorder %s1337_s29, %s1006_s18  ;;  %p1011_p6 = scmp.lt.u32.totalorder %s1337_s29, %s1392_s6 }
 0x246   : > { %p1012_p7 = scmp.lt.u32.totalorder %s1010_s12, %s1006_s18  ;;  %p1014_p8 = scmp.lt.u32.totalorder %s1006_s18, %s1337_s29 }
 0x247   : > { %p1008_p4 = pnand %p1007_p0, %p1407_p12 }
 0x248   : > { %p1013_p2 = por %p1012_p7, %p1011_p6 }
 0x249   : > { %p1009_p13 = pneg %p1008_p4 }
 0x24a   : > { %p1015_p1 = por %p1014_p8, %p1013_p2 }
 0x24c   : > { %p1016_p10 = pnand %p1015_p1, %p1009_p13 }
 0x24e   : > { %1019 = shalt.err (!%p1016_p10)
}
 0x24f   : > { %813 = dma.vmem_to_hbm [thread:$0]  (%p1407_p12), %s1339_s7, 128, %s1337_s29, %s583_s21  }
 0x250 PF: > { %s608_s20 = sand.u32 1, %s1058_s23   ;;  %p1408_p3 = scmp.ne.s32.totalorder %s1400_s9, 0 }
 0x251   : > { %p1409_p5 = scmp.ge.s32.totalorder %s1078_s28, 2  ;;  %s609_s19 = scalar_lea.sflag [#allocation5], %s608_s20 }
 0x253   : > { %p827_p9 = pnand %p1409_p5, %p1408_p3 }
 0x255   : > { %1053 = dma.done.wait (!%p827_p9), %s609_s19, 128  }
 0x256   : > { %1055 = vsyncadd (!%p827_p9), %s609_s19, 4294967168  ;;  %s24_s28 = sadd.s32 1, %s1078_s28   ;;  %s1410_s23 = smov %s1062_s24 }
 0x257   : > { %p21_p11 = scmp.ge.s32.totalorder %s24_s28, 4   ;;  %s1411_s24 = smov %s1066_s25 }
 0x258   : > { %s1412_s25 = smov %s1268_s11  ;;  %s1413_s26 = smov %s1074_s27 }
 0x259   : > { %s1414_s27 = smov %s1416_s17  ;;  %23 = sbr.rel (!%p21_p11) target bundleno = 9 (0x9), region = 110 }
 0x260   :  { %614 = vsyncpa [#allocation4], 1 }
 0x261   :  { %616 = vsyncpa [#allocation4 + $0x1], 1 }
 0x262   :  { %617 = vsyncpa [#allocation7], 1 }
 0x263   :  { %618 = vsyncpa [#allocation5], 1 }
 0x264   :  { %620 = vsyncpa [#allocation5 + $0x1], 1 }

</bundles_post_ra>
